<compile_context>
chip_gen: v6e
topology: v6e:2x2x1
jax: 0.10.0
libtpu: 0.0.40
codegen_flags: <defaults>
</compile_context>

<pallas_src>
import math
from functools import partial

import numpy as np
import jax
import jax.numpy as jnp
from jax.experimental import pallas as pl
from jax.experimental.pallas import tpu as pltpu


# ----------------------------- kernels --------------------------------------


def _pe_add_kernel(x_ref, pe_ref, o_ref, *, batch, emb):
    """Eval path: out = x + pe, written per lane-aligned batch slice.

    No (ts, B*E) temporary: each E-wide slice (E % 128 == 0 guaranteed by the
    caller) is loaded, added and stored directly.
    """
    pe = pe_ref[...]                                    # (ts, E)
    for b in range(batch):                              # statically unrolled
        sl = slice(b * emb, (b + 1) * emb)
        o_ref[:, sl] = x_ref[:, sl] + pe


def _pe_add_dropout_kernel(seed_ref, x_ref, pe_ref, o_ref, *, batch, emb, p):
    """Training path: inverted dropout fused with the positional add, per slice."""
    pe = pe_ref[...]                                    # (ts, E)
    # Distinct hardware-PRNG stream per (seed, tile): passing program_id as a
    # separate seed word avoids correlated masks between consecutive per-layer
    # seeds and neighbouring tiles.
    pltpu.prng_seed(seed_ref[0], pl.program_id(0))
    # Integer-domain threshold compare (no u32->f32 convert); P(keep) ~= 1 - p.
    thr = jnp.asarray(min(int(round(p * 4294967296.0)), 4294967295), jnp.uint32)
    for b in range(batch):
        sl = slice(b * emb, (b + 1) * emb)
        y = x_ref[:, sl] + pe
        bits = pltpu.bitcast(pltpu.prng_random_bits(y.shape), jnp.uint32)
        keep = bits >= thr
        scale = jnp.asarray(1.0 / (1.0 - p), dtype=y.dtype)
        o_ref[:, sl] = jnp.where(keep, y * scale, jnp.zeros_like(y))


# ----------------------------- module ---------------------------------------


class PositionalEncoding:
    """JAX/Pallas port of the torch PositionalEncoding module."""

    def __init__(self, emb_size: int, dropout: float, maxlen: int = 5000):
        den = jnp.exp(
            -jnp.arange(0, emb_size, 2, dtype=jnp.float32)
            * (math.log(10000.0) / emb_size)
        )
        pos = jnp.arange(0, maxlen, dtype=jnp.float32)[:, None]
        ang = pos * den                                   # (maxlen, ceil(E/2))
        pe = jnp.zeros((maxlen, emb_size), dtype=jnp.float32)
        pe = pe.at[:, 0::2].set(jnp.sin(ang))
        pe = pe.at[:, 1::2].set(jnp.cos(ang[:, : emb_size // 2]))  # odd-E safe
        self._pe_f32 = pe                                 # (maxlen, E), 2-D
        # cache key: (dtype, length or None for full maxlen)
        self._pe_cache = {(np.dtype(jnp.float32), None): pe}
        self.emb_size = int(emb_size)
        self.maxlen = int(maxlen)
        self.dropout = float(dropout)

    # -- helpers --------------------------------------------------------------

    def _pe_for(self, dtype, length=None):
        key = (np.dtype(dtype), length)
        buf = self._pe_cache.get(key)
        if buf is None:
            base = self._pe_cache.get((np.dtype(dtype), None))
            if base is None:
                base = self._pe_f32.astype(dtype)
                self._pe_cache[(np.dtype(dtype), None)] = base
            buf = base if length is None else base[:length]
            self._pe_cache[key] = buf
        return buf

    @staticmethod
    def _vmem_capacity_bytes():
        try:
            info = pltpu.get_tpu_info()
            return int(getattr(info, "vmem_capacity_bytes", 128 << 20))
        except Exception:
            return 128 << 20

    def _jnp_forward(self, x, training, seed):
        """Fused XLA fallback (lane-sparse widths or non-TPU backends)."""
        S = x.shape[0]
        y = x + self._pe_for(x.dtype)[:S][:, None, :]
        p = self.dropout
        if training and p > 0.0:
            keep = jax.random.bernoulli(jax.random.PRNGKey(seed), 1.0 - p, y.shape)
            y = jnp.where(keep, y * jnp.asarray(1.0 / (1.0 - p), y.dtype),
                          jnp.zeros_like(y))
        return y

    # -- forward ---------------------------------------------------------------

    def __call__(self, token_embedding, *, training: bool = False, seed: int = 0):
        S, B, E = token_embedding.shape
        assert E == self.emb_size, "embedding size mismatch"
        assert S <= self.maxlen, "sequence longer than positional-encoding table"
        dtype = token_embedding.dtype
        p = self.dropout

        if training and p >= 1.0:
            return jnp.zeros_like(token_embedding)

        # Lane-density guard: per-batch slices must be 128-lane aligned or the
        # output stores become masked vst.msk; at such widths XLA's fused
        # elementwise op wins anyway.
        if E % 128 != 0:
            return self._jnp_forward(token_embedding, training, seed)

        # The TPU hardware PRNG has no CPU/interpret lowering; off-TPU use the
        # fused XLA fallback for the dropout path.
        on_tpu = jax.default_backend() == "tpu"
        if training and p > 0.0 and not on_tpu:
            return self._jnp_forward(token_embedding, training, seed)

        itemsize = np.dtype(dtype).itemsize
        sub = max(8, 8 * (4 // max(itemsize, 1)))   # sublane packing multiple
        row_bytes = B * E * itemsize

        # ---- sequence tile ----------------------------------------------------
        # ~2 MiB x-block: enough for >=85% of HBM roofline, small enough that
        # double-buffered x/out/pe plus u32 PRNG bits + select temporaries stay
        # far under v7x's 64 MiB VMEM (and the default scoped limits).
        ts = max(sub, ((2 << 20) // max(row_bytes, 1)) // sub * sub)
        # Keep >= 8 grid steps when S allows: DMA/compute overlap + both v7x TCs.
        c8 = -(-S // 8)
        ts8 = -(-c8 // sub) * sub
        ts = min(ts, max(sub, ts8))
        if ts >= S:
            ts = S                                  # single full block (any S)
        n_blocks = pl.cdiv(S, ts)

        # Pos table: full (maxlen, E) buffer, no per-call slice/cast.  Only the
        # odd-length single-block case needs a (memoized) sliced buffer so the
        # pe block shape satisfies the (8,128) constraint.
        if ts % 8 == 0:
            pe_buf = self._pe_for(dtype)
        else:
            pe_buf = self._pe_for(dtype, S)

        x2d = token_embedding.reshape(S, B * E)     # free: batch folded into lanes
        out_shape = jax.ShapeDtypeStruct((S, B * E), dtype)

        vmem_cap = self._vmem_capacity_bytes()
        cparams = pltpu.CompilerParams(
            dimension_semantics=("parallel",),      # independent tiles; 2 TCs on v7x
            vmem_limit_bytes=int(min(vmem_cap * 3 // 4, 96 << 20)),
        )

        if training and p > 0.0:
            kernel = partial(_pe_add_dropout_kernel, batch=B, emb=E, p=p)
            seed_arr = jnp.asarray([seed], dtype=jnp.int32)
            out2d = pl.pallas_call(
                kernel,
                out_shape=out_shape,
                grid_spec=pltpu.PrefetchScalarGridSpec(
                    num_scalar_prefetch=1,          # dropout seed in SMEM
                    grid=(n_blocks,),
                    in_specs=[
                        pl.BlockSpec((ts, B * E), lambda i, s: (i, 0)),
                        pl.BlockSpec((ts, E), lambda i, s: (i, 0)),
                    ],
                    out_specs=pl.BlockSpec((ts, B * E), lambda i, s: (i, 0)),
                ),
                compiler_params=cparams,
            )(seed_arr, x2d, pe_buf)
        else:
            # Eval / p == 0: no seed arg, no scalar prefetch on the hot path.
            kernel = partial(_pe_add_kernel, batch=B, emb=E)
            out2d = pl.pallas_call(
                kernel,
                out_shape=out_shape,
                grid=(n_blocks,),
                in_specs=[
                    pl.BlockSpec((ts, B * E), lambda i: (i, 0)),
                    pl.BlockSpec((ts, E), lambda i: (i, 0)),
                ],
                out_specs=pl.BlockSpec((ts, B * E), lambda i: (i, 0)),
                compiler_params=cparams,
            )(x2d, pe_buf)

        return out2d.reshape(S, B, E)


if __name__ == "__main__":
    # Small shapes consistent with the module's seq-first convention;
    # E = 128 keeps the per-batch slices lane-dense so the Pallas path runs.
    seq_len, batch, emb_size = 8, 2, 128

    key = jax.random.PRNGKey(0)
    x = jax.random.normal(key, (seq_len, batch, emb_size), dtype=jnp.float32)

    module = PositionalEncoding(emb_size=emb_size, dropout=0.1, maxlen=5000)

    # ---- inference (eval) mode: dropout is the identity ---------------------
    out = jax.block_until_ready(module(x, training=False))
    ref = x + module._pe_f32[:seq_len][:, None, :]
    assert out.shape == (seq_len, batch, emb_size)
    assert jnp.allclose(out, ref, atol=1e-6, rtol=1e-6)

    # ---- training mode: every element is either 0 or (x+pe)/(1-p) -----------
    out_tr = jax.block_until_ready(module(x, training=True, seed=123))
    scaled = ref * (1.0 / (1.0 - module.dropout))
    match = jnp.isclose(out_tr, scaled, rtol=1e-5, atol=1e-6) | (out_tr == 0.0)
    assert out_tr.shape == (seq_len, batch, emb_size)
    assert bool(jnp.all(match))

    print("KERNEL_OK")
</pallas_src>

<mosaic_0001>
module attributes {stable_mosaic.version = 11 : i64} {
  func.func @_pe_add_kernel(%arg0: i32, %arg1: memref<8x256xf32, #tpu.memory_space<vmem>>, %arg2: memref<8x128xf32, #tpu.memory_space<vmem>>, %arg3: memref<8x256xf32, #tpu.memory_space<vmem>>) attributes {dimension_semantics = [#tpu.dimension_semantics<parallel>], iteration_bounds = array<i64: 1>, scalar_prefetch = 0 : i64, scratch_operands = 0 : i64, tpu.core_type = #tpu.core_type<tc>, window_params = [{transform_indices = @transform_0, window_bounds = array<i64: 8, 256>}, {transform_indices = @transform_1, window_bounds = array<i64: 8, 128>}, {transform_indices = @transform_2, window_bounds = array<i64: 8, 256>}]} {
    %c0 = arith.constant 0 : index
    %c0_0 = arith.constant 0 : index
    %0 = vector.load %arg2[%c0, %c0_0] : memref<8x128xf32, #tpu.memory_space<vmem>>, vector<8x128xf32>
    %c0_1 = arith.constant 0 : index
    %c0_2 = arith.constant 0 : index
    %1 = vector.load %arg1[%c0_1, %c0_2] : memref<8x256xf32, #tpu.memory_space<vmem>>, vector<8x128xf32>
    %2 = arith.addf %1, %0 : vector<8x128xf32>
    %c0_3 = arith.constant 0 : index
    %c0_4 = arith.constant 0 : index
    %3 = vector.load %arg3[%c0_3, %c0_4] : memref<8x256xf32, #tpu.memory_space<vmem>>, vector<8x128xf32>
    tpu.vector_store %arg3[%c0_3, %c0_4], %2 {strides = array<i32>} : memref<8x256xf32, #tpu.memory_space<vmem>>, vector<8x128xf32>,
    %c0_5 = arith.constant 0 : index
    %c128 = arith.constant 128 : index
    %4 = vector.load %arg1[%c0_5, %c128] : memref<8x256xf32, #tpu.memory_space<vmem>>, vector<8x128xf32>
    %5 = arith.addf %4, %0 : vector<8x128xf32>
    %c0_6 = arith.constant 0 : index
    %c128_7 = arith.constant 128 : index
    %6 = vector.load %arg3[%c0_6, %c128_7] : memref<8x256xf32, #tpu.memory_space<vmem>>, vector<8x128xf32>
    tpu.vector_store %arg3[%c0_6, %c128_7], %5 {strides = array<i32>} : memref<8x256xf32, #tpu.memory_space<vmem>>, vector<8x128xf32>,
    return
  }
  func.func @transform_0(%arg0: i32) -> (i32, i32) {
    %c0_i32 = arith.constant 0 : i32
    %c0_i32_0 = arith.constant 0 : i32
    return %arg0, %c0_i32 : i32, i32
  }
  func.func @transform_1(%arg0: i32) -> (i32, i32) {
    %c0_i32 = arith.constant 0 : i32
    %c0_i32_0 = arith.constant 0 : i32
    return %arg0, %c0_i32 : i32, i32
  }
  func.func @transform_2(%arg0: i32) -> (i32, i32) {
    %c0_i32 = arith.constant 0 : i32
    %c0_i32_0 = arith.constant 0 : i32
    return %arg0, %c0_i32 : i32, i32
  }
}

</mosaic_0001>

<bundles_post_ra>
// kernel: tpu_custom_call.1
= control target key start
LH: loop header
LB: loop body
LE: loop exit
PB: predicated region body
PF: predicated region fallthrough
CT: control target
= control target key end

     0   :  { %7 = vsyncpa [#allocation3], 0  ;;  %s155_s0 = inlined_call_operand.hbm [shape: f32[8,256], index: 0, kind: input, shape index: {}]   ;;  %s156_s1 = inlined_call_operand.hbm [shape: f32[5000,128], index: 1, kind: input, shape index: {}]   ;;  %s157_s2 = inlined_call_operand.hbm [shape: f32[8,256], index: 2, kind: output, shape index: {}]  }
   0x1   :  { %8 = vsyncpa [#allocation6], 0 }
   0x2   :  { %9 = vsyncpa [#allocation4], 0  ;;  %s128_s9 = smov [#allocation2]   ;;  %s129_s11 = smov [#allocation5]  }
   0x3   :  { %s16_s10 = sshll.u32 %s128_s9, 4  ;;  %s26_s12 = sshll.u32 %s129_s11, 4  ;;  %s17_s10 = int_to_ptr.vmem [resolvable:$true] %s16_s10  ;;  %s27_s12 = int_to_ptr.vmem [resolvable:$true] %s26_s12 }
   0x4   :  { %s70_s13 = scalar_lea.vmem %s17_s10, 256  ;;  %p75_p1 = scmp.lt.s32.totalorder %s17_s10, %s17_s10 }
   0x5   :  { %p71_p0 = scmp.ne.s32.totalorder %s17_s10, %s70_s13  ;;  %p76_p2 = scmp.lt.s32.totalorder %s70_s13, %s70_s13 }
   0x7   :  { %p77_p3 = por %p76_p2, %p75_p1 }
   0x9   :  { %p78_p4 = pnand %p77_p3, %p71_p0 }
   0xb   :  { %81 = shalt.err (!%p78_p4)
}
   0xc   :  { %19 = dma.hbm_to_vmem [thread:$0]  %s155_s0, 256, %s17_s10, [#allocation3]  }
   0xd   :  { %s90_s16 = scalar_lea.vmem %s27_s12, 128  ;;  %p95_p6 = scmp.lt.s32.totalorder %s27_s12, %s27_s12 }
   0xe   :  { %p91_p5 = scmp.ne.s32.totalorder %s27_s12, %s90_s16  ;;  %p96_p7 = scmp.lt.s32.totalorder %s90_s16, %s90_s16 }
  0x10   :  { %p97_p8 = por %p96_p7, %p95_p6 }
  0x12   :  { %p98_p9 = pnand %p97_p8, %p91_p5 }
  0x14   :  { %101 = shalt.err (!%p98_p9)
}
  0x15   :  { %29 = dma.hbm_to_vmem [thread:$0]  %s156_s1, 128, %s27_s12, [#allocation6]  }
  0x16   :  { %122 = dma.done.wait [#allocation3], 256  }
  0x17   :  { %123 = vsyncadd [#allocation3], 4294967040 }
  0x18   :  { %124 = dma.done.wait [#allocation6], 128  }
  0x19   :  { %125 = vsyncadd [#allocation6], 4294967168  ;;  %s130_s19 = smov [#allocation7]   ;;  %v36_v0 = vld [vmem:[#allocation5] sm:$0xff]  ;;  %v37_v1 = vld [vmem:[#allocation2] sm:$0xff] }
  0x1a   :  { %s49_s20 = sshll.u32 %s130_s19, 4  ;;  %v40_v2 = vld [vmem:[#allocation2 + $0x8] sm:$0xff]  ;;  %v38_v3 = vadd.f32 %v37_v1, %v36_v0  ;;  %s50_s20 = int_to_ptr.vmem [resolvable:$true] %s49_s20 }
  0x1b   :  { %v41_v4 = vadd.f32 %v40_v2, %v36_v0  ;;  %s102_s0 = scalar_lea.vmem %s50_s20, 256  ;;  %p107_p11 = scmp.lt.s32.totalorder %s50_s20, %s50_s20 }
  0x1c   :  { %39 = vst [vmem:[#allocation7] sm:$0xff] %v38_v3  ;;  %p103_p10 = scmp.ne.s32.totalorder %s50_s20, %s102_s0  ;;  %p108_p12 = scmp.lt.s32.totalorder %s102_s0, %s102_s0 }
  0x1d   :  { %42 = vst [vmem:[#allocation7 + $0x8] sm:$0xff] %v41_v4 }
  0x1e   :  { %p109_p13 = por %p108_p12, %p107_p11 }
  0x20   :  { %p110_p0 = pnand %p109_p13, %p103_p10 }
  0x22   :  { %113 = shalt.err (!%p110_p0)
}
  0x23   :  { %52 = dma.vmem_to_hbm [thread:$0]  %s50_s20, 256, %s157_s2, [#allocation4]  }
  0x24   :  { %126 = dma.done.wait [#allocation4], 256  }
  0x25   :  { %127 = vsyncadd [#allocation4], 4294967040 }
  0x26   :  { %56 = vsyncpa [#allocation3], 1 }
  0x27   :  { %57 = vsyncpa [#allocation6], 1 }
  0x28   :  { %58 = vsyncpa [#allocation4], 1 }

</bundles_post_ra>
